<compile_context>
chip_gen: v7x
topology: tpu7x:2x2x1
jax: 0.10.0
libtpu: 0.0.40
codegen_flags: <defaults>
</compile_context>

<pallas_src>
from functools import partial

import jax
import jax.numpy as jnp
from jax.experimental import pallas as pl
from jax.experimental.pallas import tpu as pltpu

DIMS = [768, 1024, 128, 64, 16, 1]  # layer widths of the MLP


# ----------------------------------------------------------------------------
# Kernels
# ----------------------------------------------------------------------------
def _folded_kernel(x_ref, w_ref, b_ref, o_ref):
    # x_ref: (tile, 768) f32; w_ref: (1, 768) f32 (whole net folded); b: (1,1).
    x = x_ref[...].astype(jnp.float32)
    # VPU multiply + XLU lane reduction; a (tile,768)@(768,1) MXU matmul would
    # waste 127/128 output lanes.
    out = jnp.sum(x * w_ref[...], axis=-1, keepdims=True) + b_ref[...]
    # NOTE(perf review, lane-dense output): the last-dim-1 store is a masked
    # vst + tiny writeback, but after the full fold the kernel reads 3072 B/row
    # and writes 4 B/row (~0.1%), so it stays x-read bound, never store-bound;
    # the (tile,1)->(1,tile) transpose is intentionally skipped.
    # TODO(synk): revisit lane-dense output if a store-bound regime appears.
    o_ref[...] = out.astype(o_ref.dtype)


def _layered_kernel(x_ref, w1_ref, b1_ref, w2_ref, b2_ref, wt_ref, bt_ref,
                    o_ref):
    # In-kernel cast (perf review): x arrives f32; the cast is VPU work hidden
    # under the MXU and avoids a separate full-HBM cast pass in the wrapper.
    x = x_ref[...].astype(w1_ref.dtype)
    # Layer 1: (tile, 768) @ (768, 1024) on the MXU, f32 accumulation.
    h1 = jnp.dot(x, w1_ref[...], preferred_element_type=jnp.float32) + b1_ref[...]
    # Dropout(0.2) == identity at inference.
    # Layer 2: (tile, 1024) @ (1024, 128), f32 accumulation.
    h2 = jnp.dot(h1.astype(w2_ref.dtype), w2_ref[...],
                 preferred_element_type=jnp.float32) + b2_ref[...]
    # Dropout(0.2)/Dropout(0.1) == identity; layers 3..5 (128->64->16->1) are a
    # purely affine tail folded in the wrapper to a single (1, 128) row:
    out = jnp.sum(h2 * wt_ref[...], axis=-1, keepdims=True) + bt_ref[...]
    o_ref[...] = out.astype(o_ref.dtype)


# ----------------------------------------------------------------------------
# Once-per-parameter-set preprocessing (hoisted out of the forward path)
# ----------------------------------------------------------------------------
def fold_affine(params):
    """Fold the whole inference-mode network into one affine map (768 -> 1).

    Valid ONLY because every Dropout is the identity under eval()/no_grad and
    there is no nonlinearity.  Call once per parameter set.
    Returns (w_row (1, 768), b (1, 1)), both float32.
    """
    (w1, b1), (w2, b2), (w3, b3), (w4, b4), (w5, b5) = params
    w = w1 @ w2 @ w3 @ w4 @ w5                                # (768, 1)
    b = (((b1 @ w2 + b2) @ w3 + b3) @ w4 + b4) @ w5 + b5      # (1, 1)
    return w.T.astype(jnp.float32), b.astype(jnp.float32)


def prepare_layered(params, compute_dtype=jnp.bfloat16):
    """Preprocess weights for the layered kernel.  Call once per parameter set.

    compute_dtype=bf16 is the default on ALL chips (v5e included): the MXU is
    full-rate bf16 everywhere; only VPU work stays f32.
    """
    (w1, b1), (w2, b2), (w3, b3), (w4, b4), (w5, b5) = params
    wt = (w3 @ w4 @ w5).T                       # (1, 128)  folded affine tail
    bt = b3 @ w4 @ w5 + b4 @ w5 + b5            # (1, 1)
    return (w1.astype(compute_dtype), b1.astype(jnp.float32),
            w2.astype(compute_dtype), b2.astype(jnp.float32),
            wt.astype(jnp.float32), bt.astype(jnp.float32))


# ----------------------------------------------------------------------------
# Tile selection
# ----------------------------------------------------------------------------
def _round_up(x, m):
    return -(-x // m) * m


def pick_batch_tile(batch, desired=512, min_steps=4):
    # Perf review: 128-row steps are per-grid-step-overhead bound on v6e/v7x
    # (~0.35us overhead >= MXU time) and half-fill the 256-wide MXU; use
    # 256-512 rows, but clamp so the grid keeps >= min_steps steps (v7x's two
    # TensorCores need >= 2, ideally >= 4, steps so both get work and DMAs
    # pipeline).  Multiple of 8 for the sublane constraint.
    t = min(desired, _round_up(pl.cdiv(batch, min_steps), 8))
    return max(8, t)


# ----------------------------------------------------------------------------
# pallas_call wrappers
# ----------------------------------------------------------------------------
@partial(jax.jit, static_argnames=("batch_tile",))
def _folded_pallas(x, w_row, b, *, batch_tile):
    B, D = x.shape
    num_tiles = pl.cdiv(B, batch_tile)   # no jnp.pad pass over x; the partial
    Bp = num_tiles * batch_tile          # last block is handled by Pallas and
                                         # padded output rows are sliced off.
    cost = pl.CostEstimate(
        flops=2 * Bp * D, transcendentals=0,
        bytes_accessed=x.size * x.dtype.itemsize
        + (w_row.size + b.size) * 4 + Bp * 4)

    out = pl.pallas_call(
        _folded_kernel,
        out_shape=jax.ShapeDtypeStruct((Bp, 1), jnp.float32),
        grid_spec=pltpu.PrefetchScalarGridSpec(
            num_scalar_prefetch=0,
            grid=(num_tiles,),
            in_specs=[
                pl.BlockSpec((batch_tile, D), lambda i: (i, 0)),
                pl.BlockSpec(w_row.shape, lambda i: (0, 0)),
                pl.BlockSpec(b.shape, lambda i: (0, 0)),
            ],
            out_specs=pl.BlockSpec((batch_tile, 1), lambda i: (i, 0)),
        ),
        compiler_params=pltpu.CompilerParams(
            dimension_semantics=("parallel",)),
        cost_estimate=cost,
    )(x, w_row, b)
    return out[:B]


@partial(jax.jit, static_argnames=("batch_tile",))
def _layered_pallas(x, w1, b1, w2, b2, wt, bt, *, batch_tile):
    B, D = x.shape
    num_tiles = pl.cdiv(B, batch_tile)
    Bp = num_tiles * batch_tile
    d1, d2 = w1.shape[1], w2.shape[1]
    witem = w1.dtype.itemsize
    cost = pl.CostEstimate(
        flops=2 * Bp * (D * d1 + d1 * d2 + d2),
        transcendentals=0,
        bytes_accessed=(x.size * x.dtype.itemsize
                        + (w1.size + w2.size) * witem
                        + (b1.size + b2.size + wt.size + bt.size) * 4
                        + Bp * 4))

    const = lambda i: (0, 0)  # grid-invariant weights / biases (never refetched)
    # NOTE(perf review, v7x): the six grid-invariant operands could be
    # single-buffered via pipeline_mode=pl.Buffered(1) to halve their VMEM, but
    # VMEM is not the constraint at these tile sizes on any generation, so the
    # default buffering is kept for lowering robustness.
    out = pl.pallas_call(
        _layered_kernel,
        out_shape=jax.ShapeDtypeStruct((Bp, 1), jnp.float32),
        grid_spec=pltpu.PrefetchScalarGridSpec(
            num_scalar_prefetch=0,
            grid=(num_tiles,),
            in_specs=[
                pl.BlockSpec((batch_tile, D), lambda i: (i, 0)),
                pl.BlockSpec(w1.shape, const),
                pl.BlockSpec(b1.shape, const),
                pl.BlockSpec(w2.shape, const),
                pl.BlockSpec(b2.shape, const),
                pl.BlockSpec(wt.shape, const),
                pl.BlockSpec(bt.shape, const),
            ],
            out_specs=pl.BlockSpec((batch_tile, 1), lambda i: (i, 0)),
        ),
        compiler_params=pltpu.CompilerParams(
            dimension_semantics=("parallel",),
            # Headroom for f32 weights at tile=512 (still < v7x's 64 MiB phys).
            vmem_limit_bytes=32 * 1024 * 1024,
        ),
        cost_estimate=cost,
    )(x, w1, b1, w2, b2, wt, bt)
    return out[:B]


def mlp_forward(x, folded, *, batch_tile=None):
    """Inference forward via the fully-folded affine kernel (default path).

    `folded` = fold_affine(params), computed once per parameter set.
    """
    if batch_tile is None:
        batch_tile = pick_batch_tile(x.shape[0])
    w_row, b = folded
    return _folded_pallas(x, w_row, b, batch_tile=batch_tile)


def mlp_forward_layered(x, prepared, *, batch_tile=None):
    """Inference forward via the layered (MXU) kernel.

    `prepared` = prepare_layered(params, dtype), computed once per param set.
    """
    if batch_tile is None:
        batch_tile = pick_batch_tile(x.shape[0])
    return _layered_pallas(x, *prepared, batch_tile=batch_tile)


# ----------------------------------------------------------------------------
# Reference & init
# ----------------------------------------------------------------------------
def init_params(key):
    """PyTorch nn.Linear-style init (uniform +-1/sqrt(fan_in)), [in,out] layout."""
    params = []
    for i in range(len(DIMS) - 1):
        fan_in, fan_out = DIMS[i], DIMS[i + 1]
        key, kw, kb = jax.random.split(key, 3)
        bound = 1.0 / (fan_in ** 0.5)
        w = jax.random.uniform(kw, (fan_in, fan_out), jnp.float32,
                               minval=-bound, maxval=bound)
        b = jax.random.uniform(kb, (1, fan_out), jnp.float32,
                               minval=-bound, maxval=bound)
        params.append((w, b))
    return params


def mlp_reference(x, params):
    h = x
    for (w, b) in params:
        h = h @ w + b   # Dropout layers are identity at inference
    return h


if __name__ == "__main__":
    key = jax.random.PRNGKey(0)
    key, kx = jax.random.split(key)

    B = 200  # small batch, deliberately NOT a multiple of the batch tile
    x = jax.random.normal(kx, (B, DIMS[0]), jnp.float32)
    params = init_params(key)
    ref = mlp_reference(x, params)

    # Default path: whole network folded to one 768->1 affine map.
    folded = fold_affine(params)                        # once per param set
    out = jax.block_until_ready(mlp_forward(x, folded))
    assert out.shape == (B, 1), out.shape
    assert jnp.allclose(out, ref, atol=1e-3, rtol=1e-3), (
        f"folded max err {jnp.max(jnp.abs(out - ref))}")

    # Layered path, bf16 MXU operands (default, all chips including v5e).
    prep_bf16 = prepare_layered(params, jnp.bfloat16)   # once per param set
    out_bf16 = jax.block_until_ready(mlp_forward_layered(x, prep_bf16))
    assert out_bf16.shape == (B, 1), out_bf16.shape
    assert jnp.allclose(out_bf16, ref, atol=5e-2, rtol=5e-2), (
        f"bf16 max err {jnp.max(jnp.abs(out_bf16 - ref))}")

    # Layered path, f32 operands (tight-tolerance structural check).
    prep_f32 = prepare_layered(params, jnp.float32)
    out_f32 = jax.block_until_ready(mlp_forward_layered(x, prep_f32))
    assert jnp.allclose(out_f32, ref, atol=1e-3, rtol=1e-3), (
        f"f32 max err {jnp.max(jnp.abs(out_f32 - ref))}")

    print("KERNEL_OK")
</pallas_src>

<mosaic_0001>
module attributes {stable_mosaic.version = 11 : i64} {
  func.func @_folded_kernel(%arg0: i32, %arg1: memref<56x768xf32, #tpu.memory_space<vmem>>, %arg2: memref<1x768xf32, #tpu.memory_space<vmem>>, %arg3: memref<1x1xf32, #tpu.memory_space<vmem>>, %arg4: memref<56x1xf32, #tpu.memory_space<vmem>>) attributes {dimension_semantics = [#tpu.dimension_semantics<parallel>], iteration_bounds = array<i64: 4>, scalar_prefetch = 0 : i64, scratch_operands = 0 : i64, tpu.core_type = #tpu.core_type<tc>, window_params = [{transform_indices = @transform_0, window_bounds = array<i64: 56, 768>}, {pipeline_mode = #tpu.pipeline_mode<synchronous>, transform_indices = @transform_1, window_bounds = array<i64: 1, 768>}, {pipeline_mode = #tpu.pipeline_mode<synchronous>, transform_indices = @transform_2, window_bounds = array<i64: 1, 1>}, {transform_indices = @transform_3, window_bounds = array<i64: 56, 1>}]} {
    %c0 = arith.constant 0 : index
    %c0_0 = arith.constant 0 : index
    %0 = vector.load %arg1[%c0, %c0_0] : memref<56x768xf32, #tpu.memory_space<vmem>>, vector<56x768xf32>
    %c0_1 = arith.constant 0 : index
    %c0_2 = arith.constant 0 : index
    %1 = vector.load %arg2[%c0_1, %c0_2] : memref<1x768xf32, #tpu.memory_space<vmem>>, vector<1x768xf32>
    %2 = vector.broadcast %1 : vector<1x768xf32> to vector<56x768xf32>
    %3 = arith.mulf %0, %2 : vector<56x768xf32>
    %cst = arith.constant dense<0.000000e+00> : vector<56xf32>
    %4 = vector.multi_reduction <add>, %3, %cst [1] : vector<56x768xf32> to vector<56xf32>
    %5 = vector.shape_cast %4 : vector<56xf32> to vector<56x1xf32>
    %c0_3 = arith.constant 0 : index
    %c0_4 = arith.constant 0 : index
    %6 = vector.load %arg3[%c0_3, %c0_4] : memref<1x1xf32, #tpu.memory_space<vmem>>, vector<1x1xf32>
    %7 = vector.broadcast %6 : vector<1x1xf32> to vector<56x1xf32>
    %8 = arith.addf %5, %7 : vector<56x1xf32>
    %c0_5 = arith.constant 0 : index
    %c0_6 = arith.constant 0 : index
    %9 = vector.load %arg4[%c0_5, %c0_6] : memref<56x1xf32, #tpu.memory_space<vmem>>, vector<56x1xf32>
    tpu.vector_store %arg4[%c0_5, %c0_6], %8 {strides = array<i32>} : memref<56x1xf32, #tpu.memory_space<vmem>>, vector<56x1xf32>,
    return
  }
  func.func @transform_0(%arg0: i32) -> (i32, i32) {
    %c0_i32 = arith.constant 0 : i32
    %c0_i32_0 = arith.constant 0 : i32
    return %arg0, %c0_i32 : i32, i32
  }
  func.func @transform_1(%arg0: i32) -> (i32, i32) {
    %c0_i32 = arith.constant 0 : i32
    %c0_i32_0 = arith.constant 0 : i32
    %c0_i32_1 = arith.constant 0 : i32
    return %c0_i32, %c0_i32_0 : i32, i32
  }
  func.func @transform_2(%arg0: i32) -> (i32, i32) {
    %c0_i32 = arith.constant 0 : i32
    %c0_i32_0 = arith.constant 0 : i32
    %c0_i32_1 = arith.constant 0 : i32
    return %c0_i32, %c0_i32_0 : i32, i32
  }
  func.func @transform_3(%arg0: i32) -> (i32, i32) {
    %c0_i32 = arith.constant 0 : i32
    %c0_i32_0 = arith.constant 0 : i32
    return %arg0, %c0_i32 : i32, i32
  }
}

</mosaic_0001>

<bundles_post_ra>
// kernel: _folded_pallas.1
= control target key start
LH: loop header
LB: loop body
LE: loop exit
PB: predicated region body
PF: predicated region fallthrough
CT: control target
= control target key end

     0   :  { %s819_s0 = inlined_call_operand.hbm [shape: f32[200,768], index: 0, kind: input, shape index: {}]   ;;  %s820_s1 = inlined_call_operand.vmem [shape: f32[1,768], index: 1, kind: input, shape index: {}]   ;;  %s821_s2 = inlined_call_operand.<no memory space> [shape: f32[1,1], index: 2, kind: input, shape index: {}]   ;;  %s822_s3 = inlined_call_operand.vmem [shape: f32[224,1], index: 3, kind: output, shape index: {}]  }
   0x1   :  { %v8_v0 = vstv %s821_s2 }
   0x2   :  { %9 = vst [vmem:[#allocation2] sm:$0x1] %v8_v0 }
   0x3   :  { %10 = vsyncpa [#allocation4], 0 }
   0x4   :  { %12 = vsyncpa [#allocation4 + $0x1], 0  ;;  %s605_s14 = smov 0   ;;  %s607_s15 = smov 0  }
   0x5   :  { %s609_s16 = smov 0   ;;  %s611_s17 = smov 0  }
   0x6 LB: > { %s462_s2 = sadd.s32 4294967295, %s577_s17   ;;  %s625_s18 = sadd.s32 1, %s577_s17   ;;  %s577_s17 = sphi %s611_s17, %s827_s17   ;;  %s573_s16 = sphi %s609_s16, %s826_s16   ;;  %s569_s15 = sphi %s607_s15, %s825_s15   ;;  %s565_s14 = sphi %s605_s14, %s824_s14  }
   0x7   : > { %s22_s19 = ssub.s32 %s577_s17, %s625_s18  ;;  %s25_s20 = sadd.s32 1, %s573_s16 }
   0x8   : > { %p23_p0 = scmp.eq.s32.totalorder %s22_s19, 0  ;;  %p32_p1 = scmp.ne.s32.totalorder %s573_s16, %s569_s15 }
   0x9   : > { %p33_p2 = scmp.eq.s32.totalorder %s577_s17, 0  ;;  %p38_p3 = scmp.ne.s32.totalorder %s569_s15, %s565_s14 }
   0xa   : > { %s635_s21 = scalar_select %p23_p0, %s573_s16, %s25_s20  }
   0xb   : > { %p34_p4 = por %p33_p2, %p32_p1  ;;  %p39_p5 = scmp.eq.s32.totalorder %s462_s2, 0 }
   0xc   : > { %p465_p7 = scmp.ge.s32.totalorder %s577_s17, 4 }
   0xd   : > { %p639_p6 = por %p39_p5, %p38_p3 }
   0xe   : > { %132 = sbr.rel (%p465_p7) target bundleno = 57 (0x39), region = 24 }
  0x15   : > { %135 = sbr.rel (!%p34_p4) target bundleno = 57 (0x39), region = 28  ;;  %s136_s23 = sand.u32 (%p34_p4), 1, %s573_s16  }
  0x16   : > { %s141_s24 = smul.u32 (%p34_p4), 7, %s577_s17  ;;  %s649_s29 = scalar_lea.sflag (%p34_p4), [#allocation4], %s136_s23 }
  0x17   : > { %s476_s25 = smul.u32 (%p34_p4), 336, %s136_s23 }
  0x18   : > { %s142_s26 = ssub.s32 (%p34_p4), 25, %s141_s24 }
  0x19   : > { %p143_p8 = scmp.lt.s32.totalorder (%p34_p4), %s142_s26, 7  ;;  %s140_s30 = scalar_lea.vmem (%p34_p4), [#allocation3], %s476_s25 }
  0x1c   : > { %s829_s26 = smov (!%p143_p8, %s142_s26), 7 }
  0x1d   : > { %s646_s27 = smul.u32 768, %s829_s26 }
  0x1f   : > { %s148_s28 = ssub.s32 5376, %s646_s27 }
  0x20   : > { %149 = vsyncadd %s649_s29, %s148_s28  ;;  %p468_p9 = scmp.ne.s32.totalorder %s646_s27, 0  ;;  %s480_s4 = smul.u32 5376, %s577_s17 }
  0x21   : > { %s155_s5 = sshll.u32 %s140_s30, 4  ;;  %s519_s12 = scalar_lea.hbm %s819_s0, 19200  ;;  %s659_s5 = int_to_ptr.vmem [resolvable:$true] %s155_s5 }
  0x22   : > { %s657_s8 = scalar_lea.hbm %s819_s0, %s480_s4 }
  0x23   : > { %s515_s9 = scalar_lea.hbm %s657_s8, %s646_s27  ;;  %p520_p13 = scmp.lt.u32.totalorder %s657_s8, %s819_s0 }
  0x24   : > { %p516_p10 = scmp.ne.s32.totalorder %s657_s8, %s515_s9  ;;  %p521_p0 = scmp.lt.u32.totalorder %s519_s12, %s515_s9 }
  0x25   : > { %p523_p2 = scmp.lt.u32.totalorder %s515_s9, %s657_s8 }
  0x26   : > { %p517_p11 = pnand %p516_p10, %p468_p9  ;;  %p522_p1 = por %p521_p0, %p520_p13 }
  0x28   : > { %p518_p12 = pneg %p517_p11  ;;  %p524_p3 = por %p523_p2, %p522_p1 }
  0x2a   : > { %p525_p4 = pnand %p524_p3, %p518_p12 }
  0x2c   : > { %528 = shalt.err (!%p525_p4)
}
  0x2d   : > { %s529_s19 = scalar_lea.vmem %s659_s5, %s646_s27  ;;  %s579_s20 = smov [#allocation3]  }
  0x2e   : > { %p530_p5 = scmp.ne.s32.totalorder %s659_s5, %s529_s19  ;;  %s533_s23 = sshll.u32 %s579_s20, 4  ;;  %s534_s23 = int_to_ptr.vmem [resolvable:$false] %s533_s23 }
  0x2f   : > { %s535_s24 = scalar_lea.vmem %s534_s23, 10752  ;;  %p536_p10 = scmp.lt.s32.totalorder %s659_s5, %s534_s23 }
  0x30   : > { %p531_p7 = pnand %p530_p5, %p468_p9  ;;  %p537_p11 = scmp.lt.s32.totalorder %s535_s24, %s529_s19 }
  0x32   : > { %p532_p8 = pneg %p531_p7  ;;  %p538_p13 = por %p537_p11, %p536_p10 }
  0x34   : > { %p539_p0 = pnand %p538_p13, %p532_p8 }
  0x36   : > { %542 = shalt.err (!%p539_p0)
}
  0x37   : > { %s580_s25 = smov 768   ;;  %s581_s26 = smov 48  }
  0x38   : > { %161 = dma.hbm_to_vmem [thread:$0]  (%p468_p9), %s657_s8, %s646_s27, %s659_s5, %s649_s29, %s580_s25, %s580_s25, %s581_s26  }
  0x39 PF: > { %p471_p12 = scmp.ge.s32.totalorder %s577_s17, 1  ;;  %p163_p1 = scmp.lt.s32.totalorder %s577_s17, 5 }
  0x3b   : > { %p164_p2 = pnand %p471_p12, %p163_p1 }
  0x3c   : > { %s169_s28 = sand.u32 (!%p164_p2), 1, %s569_s15  }
  0x3d   : > { %167 = sbr.rel (%p164_p2) target bundleno = 248 (0xf8), region = 32  ;;  %s170_s4 = scalar_lea.sflag (!%p164_p2), [#allocation4], %s169_s28 }
  0x3e   : > { %s478_s30 = smul.u32 (!%p164_p2), 336, %s169_s28 }
  0x40   : > { %s689_s6 = scalar_lea.vmem (!%p164_p2), [#allocation3], %s478_s30 }
  0x44   : > { %560 = dma.done.wait (%p639_p6), %s170_s4, 5376  }
  0x45   : > { %562 = vsyncadd (%p639_p6), %s170_s4, 4294961920  ;;  %v252_v1 = vlaneseq  ;;  %v208_v8 = vld [vmem:[%s689_s6] sm:$0xff]  ;;  %v209_v10 = vld [vmem:[%s689_s6 + $0x8] sm:$0xff]  ;;  %s202_s29 = smul.u32 7, %s462_s2  ;;  %vm387_vm0 = vcmask 7168  }
  0x46   : > { %v210_v11 = vld [vmem:[%s689_s6 + $0x10] sm:$0xff]  ;;  %v220_v17 = vld [vmem:[%s689_s6 + $0x60] sm:$0xff]  ;;  %v221_v18 = vld [vmem:[%s689_s6 + $0x68] sm:$0xff] }
  0x47   : > { %v253_v2 = vshrl.u32 %v252_v1, 7  ;;  %v250_v12 = vld [vmem:[%s820_s1] sm:$0x3f]  ;;  %p203_p6 = scmp.lt.s32.totalorder %s202_s29, 27 }
  0x48   : > { %v211_v19 = vld [vmem:[%s689_s6 + $0x18] sm:$0xff]  ;;  %v212_v20 = vld [vmem:[%s689_s6 + $0x20] sm:$0xff]  ;;  %v222_v22 = vld [vmem:[%s689_s6 + $0x70] sm:$0xff] }
  0x49   : > { %v254_v3 = vsub.s32 0, %v253_v2  ;;  %v258_v4 = vsub.s32 1, %v253_v2  ;;  %v262_v5 = vsub.s32 2, %v253_v2  ;;  %v266_v6 = vsub.s32 3, %v253_v2  ;;  %v223_v27 = vld [vmem:[%s689_s6 + $0x78] sm:$0xff]  ;;  %v214_v28 = vld [vmem:[%s689_s6 + $0x30] sm:$0xff] }
  0x4a   : > { %v270_v7 = vsub.s32 4, %v253_v2  ;;  %v274_v9 = vsub.s32 5, %v253_v2  ;;  %v215_v29 = vld [vmem:[%s689_s6 + $0x38] sm:$0xff]  ;;  %v213_v30 = vld [vmem:[%s689_s6 + $0x28] sm:$0xff]  ;;  %v224_v31 = vld [vmem:[%s689_s6 + $0x80] sm:$0xff]  ;;  %s831_s29 = smov (!%p203_p6, %s202_s29), 27 }
  0x4b   : > { %v701_v13 = vrot.slane %v250_v12, %v254_v3  ;;  %v703_v14 = vrot.slane %v250_v12, %v258_v4  ;;  %v705_v15 = vrot.slane %v250_v12, %v262_v5  ;;  %v707_v16 = vrot.slane %v250_v12, %v266_v6  ;;  %v216_v34 = vld [vmem:[%s689_s6 + $0x40] sm:$0xff]  ;;  %v217_v39 = vld [vmem:[%s689_s6 + $0x48] sm:$0xff]  ;;  %v226_v40 = vld [vmem:[%s689_s6 + $0x90] sm:$0xff]  ;;  %s472_s5 = sshll.u32 %s831_s29, 3 }
  0x4c   : > { %v713_v21 = vrot.slane %v250_v12, %v270_v7  ;;  %v716_v23 = vrot.slane %v250_v12, %v274_v9  ;;  %v225_v41 = vld [vmem:[%s689_s6 + $0x88] sm:$0xff]  ;;  %v227_v46 = vld [vmem:[%s689_s6 + $0x98] sm:$0xff]  ;;  %v228_v47 = vld [vmem:[%s689_s6 + $0xa0] sm:$0xff]  ;;  %s206_s9 = scalar_lea.vmem %s822_s3, %s472_s5 }
  0x4d   : > { %v282_v24 = vmul.f32 %v701_v13, %v208_v8  ;;  %v283_v25 = vmul.f32 %v703_v14, %v209_v10  ;;  %v284_v26 = vmul.f32 %v705_v15, %v210_v11  ;;  %v294_v32 = vmul.f32 %v701_v13, %v220_v17  ;;  %v218_v51 = vld [vmem:[%s689_s6 + $0x50] sm:$0xff]  ;;  %v229_v53 = vld [vmem:[%s689_s6 + $0xa8] sm:$0xff]  ;;  %v232_v58 = vld [vmem:[%s689_s6 + $0xc0] sm:$0xff] }
  0x4e   : > { %v295_v33 = vmul.f32 %v703_v14, %v221_v18  ;;  %v285_v35 = vmul.f32 %v707_v16, %v211_v19  ;;  %v286_v36 = vmul.f32 %v713_v21, %v212_v20  ;;  %v296_v38 = vmul.f32 %v705_v15, %v222_v22  ;;  %v233_v59 = vld [vmem:[%s689_s6 + $0xc8] sm:$0xff]  ;;  %v219_v62 = vld [vmem:[%s689_s6 + $0x58] sm:$0xff]  ;;  %v234_v1 = vld [vmem:[%s689_s6 + $0xd0] sm:$0xff] }
  0x4f   : > { %v324_v37 = vadd.f32 %v283_v25, %v282_v24  ;;  %v297_v42 = vmul.f32 %v707_v16, %v223_v27  ;;  %v288_v44 = vmul.f32 %v701_v13, %v214_v28  ;;  %v289_v45 = vmul.f32 %v703_v14, %v215_v29  ;;  %v230_v5 = vld [vmem:[%s689_s6 + $0xb0] sm:$0xff]  ;;  %v235_v7 = vld [vmem:[%s689_s6 + $0xd8] sm:$0xff]  ;;  %v240_v25 = vld [vmem:[%s689_s6 + $0x100] sm:$0xff] }
  0x50   : > { %v338_v43 = vadd.f32 %v295_v33, %v294_v32  ;;  %v287_v48 = vmul.f32 %v716_v23, %v213_v30  ;;  %v298_v50 = vmul.f32 %v713_v21, %v224_v31  ;;  %v290_v52 = vmul.f32 %v705_v15, %v216_v34  ;;  %v238_v12 = vld [vmem:[%s689_s6 + $0xf0] sm:$0xff]  ;;  %v231_v20 = vld [vmem:[%s689_s6 + $0xb8] sm:$0xff]  ;;  %v236_v29 = vld [vmem:[%s689_s6 + $0xe0] sm:$0xff] }
  0x51   : > { %v325_v49 = vadd.f32 %v324_v37, %v284_v26  ;;  %v291_v55 = vmul.f32 %v707_v16, %v217_v39  ;;  %v331_v56 = vadd.f32 %v289_v45, %v288_v44  ;;  %v300_v57 = vmul.f32 %v701_v13, %v226_v40  ;;  %v239_v24 = vld [vmem:[%s689_s6 + $0xf8] sm:$0xff]  ;;  %v241_v31 = vld [vmem:[%s689_s6 + $0x108] sm:$0xff]  ;;  %v246_v44 = vld [vmem:[%s689_s6 + $0x130] sm:$0xff] }
  0x52   : > { %v339_v54 = vadd.f32 %v338_v43, %v296_v38  ;;  %v299_v61 = vmul.f32 %v716_v23, %v225_v41  ;;  %v301_v63 = vmul.f32 %v703_v14, %v227_v46  ;;  %v302_v0 = vmul.f32 %v705_v15, %v228_v47  ;;  %v245_v37 = vld [vmem:[%s689_s6 + $0x128] sm:$0xff]  ;;  %v242_v41 = vld [vmem:[%s689_s6 + $0x110] sm:$0xff] }
  0x53   : > { %v326_v60 = vadd.f32 %v325_v49, %v285_v35  ;;  %v292_v3 = vmul.f32 %v713_v21, %v218_v51  ;;  %v332_v4 = vadd.f32 %v331_v56, %v290_v52  ;;  %v303_v6 = vmul.f32 %v707_v16, %v229_v53  ;;  %v237_v40 = vld [vmem:[%s689_s6 + $0xe8] sm:$0xff]  ;;  %v247_v49 = vld [vmem:[%s689_s6 + $0x138] sm:$0xff] }
  0x54   : > { %v340_v2 = vadd.f32 %v339_v54, %v297_v42  ;;  %v345_v9 = vadd.f32 %v301_v63, %v300_v57  ;;  %v306_v10 = vmul.f32 %v701_v13, %v232_v58  ;;  %v307_v11 = vmul.f32 %v703_v14, %v233_v59  ;;  %v243_v56 = vld [vmem:[%s689_s6 + $0x118] sm:$0xff]  ;;  %v248_v58 = vld [vmem:[%s689_s6 + $0x140] sm:$0xff] }
  0x55   : > { %v327_v8 = vadd.f32 %v326_v60, %v286_v36  ;;  %v293_v18 = vmul.f32 %v716_v23, %v219_v62  ;;  %v333_v19 = vadd.f32 %v332_v4, %v291_v55  ;;  %v308_v22 = vmul.f32 %v705_v15, %v234_v1  ;;  %v244_v36 = vld [vmem:[%s689_s6 + $0x120] sm:$0xff]  ;;  %v249_v1 = vld [vmem:[%s689_s6 + $0x148] sm:$0xff] }
  0x56   : > { %v341_v17 = vadd.f32 %v340_v2, %v298_v50  ;;  %v304_v27 = vmul.f32 %v713_v21, %v230_v5  ;;  %v346_v28 = vadd.f32 %v345_v9, %v302_v0  ;;  %v309_v30 = vmul.f32 %v707_v16, %v235_v7  ;;  %v473_v9 = vld [vmem:[#allocation2] ss:$0 sm:$0xff] }
  0x57   : > { %v328_v26 = vadd.f32 %v327_v8, %v287_v48  ;;  %v334_v33 = vadd.f32 %v333_v19, %v292_v3  ;;  %v352_v34 = vadd.f32 %v307_v11, %v306_v10  ;;  %v312_v35 = vmul.f32 %v701_v13, %v238_v12 }
  0x58   : > { %v342_v32 = vadd.f32 %v341_v17, %v299_v61  ;;  %v305_v38 = vmul.f32 %v716_v23, %v231_v20  ;;  %v347_v39 = vadd.f32 %v346_v28, %v303_v6  ;;  %v313_v42 = vmul.f32 %v703_v14, %v239_v24 }
  0x59   : > { %329 = vadd.xlane.f32.xlu0 %v328_v26  ;;  %v314_v43 = vmul.f32 %v705_v15, %v240_v25  ;;  %v335_v45 = vadd.f32 %v334_v33, %v293_v18  ;;  %v310_v46 = vmul.f32 %v713_v21, %v236_v29  ;;  %v353_v47 = vadd.f32 %v352_v34, %v308_v22 }
  0x5a   : > { %343 = vadd.xlane.f32.xlu1 %v342_v32  ;;  %v315_v48 = vmul.f32 %v707_v16, %v241_v31  ;;  %v348_v50 = vadd.f32 %v347_v39, %v304_v27  ;;  %v359_v51 = vadd.f32 %v313_v42, %v312_v35  ;;  %v318_v52 = vmul.f32 %v701_v13, %v244_v36 }
  0x5b   : > { %v319_v53 = vmul.f32 %v703_v14, %v245_v37  ;;  %v311_v54 = vmul.f32 %v716_v23, %v237_v40  ;;  %v354_v55 = vadd.f32 %v353_v47, %v309_v30  ;;  %v316_v57 = vmul.f32 %v713_v21, %v242_v41 }
  0x5c   : > { %v320_v59 = vmul.f32 %v705_v15, %v246_v44  ;;  %v349_v60 = vadd.f32 %v348_v50, %v305_v38  ;;  %v360_v61 = vadd.f32 %v359_v51, %v314_v43  ;;  %v321_v62 = vmul.f32 %v707_v16, %v247_v49 }
  0x5d   : > { %336 = vadd.xlane.f32.xlu0 %v335_v45  ;;  %v366_v63 = vadd.f32 %v319_v53, %v318_v52  ;;  %v355_v0 = vadd.f32 %v354_v55, %v310_v46  ;;  %v317_v13 = vmul.f32 %v716_v23, %v243_v56  ;;  %v322_v2 = vmul.f32 %v713_v21, %v248_v58 }
  0x5e   : > { %350 = vadd.xlane.f32.xlu1 %v349_v60  ;;  %v361_v14 = vadd.f32 %v360_v61, %v315_v48  ;;  %v323_v15 = vmul.f32 %v716_v23, %v249_v1 }
  0x5f   : > { %v367_v3 = vadd.f32 %v366_v63, %v320_v59  ;;  %v356_v4 = vadd.f32 %v355_v0, %v311_v54 }
  0x60   : > { %v362_v5 = vadd.f32 %v361_v14, %v316_v57 }
  0x61   : > { %v368_v6 = vadd.f32 %v367_v3, %v321_v62  ;;  %357 = vadd.xlane.f32.xlu0 %v356_v4 }
  0x62   : > { %v363_v7 = vadd.f32 %v362_v5, %v317_v13 }
  0x63   : > { %v369_v8 = vadd.f32 %v368_v6, %v322_v2 }
  0x64   : > { %364 = vadd.xlane.f32.xlu1 %v363_v7 }
  0x65   : > { %v370_v16 = vadd.f32 %v369_v8, %v323_v15 }
  0x67   : > { %371 = vadd.xlane.f32.xlu0 %v370_v16 }
  0xe6   : > { %v330_v21 = vpop.xlane.xlu0 %329 }
  0xe7   : > { %v380_v23 = vadd.f32 %v473_v9, %v330_v21  ;;  %v344_v10 = vpop.xlane.xlu1 %343 }
  0xe8   : > { %v382_v11 = vadd.f32 %v473_v9, %v344_v10 }
  0xe9   : > { %388 = vst.msk [vmem:[%s206_s9] sm:$0xff] %vm387_vm0, %v380_v23 }
  0xea   : > { %390 = vst.msk [vmem:[%s206_s9 + $0x10] sm:$0xff] %vm387_vm0, %v382_v11  ;;  %v337_v12 = vpop.xlane.xlu0 %336 }
  0xeb   : > { %v381_v17 = vadd.f32 %v473_v9, %v337_v12  ;;  %v351_v18 = vpop.xlane.xlu1 %350 }
  0xec   : > { %v383_v19 = vadd.f32 %v473_v9, %v351_v18 }
  0xed   : > { %389 = vst.msk [vmem:[%s206_s9 + $0x8] sm:$0xff] %vm387_vm0, %v381_v17 }
  0xee   : > { %391 = vst.msk [vmem:[%s206_s9 + $0x18] sm:$0xff] %vm387_vm0, %v383_v19  ;;  %v358_v20 = vpop.xlane.xlu0 %357 }
  0xef   : > { %v384_v22 = vadd.f32 %v473_v9, %v358_v20 }
  0xf1   : > { %392 = vst.msk [vmem:[%s206_s9 + $0x20] sm:$0xff] %vm387_vm0, %v384_v22  ;;  %v365_v24 = vpop.xlane.xlu1 %364 }
  0xf2   : > { %v385_v25 = vadd.f32 %v473_v9, %v365_v24 }
  0xf4   : > { %v372_v26 = vpop.xlane.xlu0 %371  ;;  %393 = vst.msk [vmem:[%s206_s9 + $0x28] sm:$0xff] %vm387_vm0, %v385_v25 }
  0xf5   : > { %v386_v27 = vadd.f32 %v473_v9, %v372_v26 }
  0xf7   : > { %394 = vst.msk [vmem:[%s206_s9 + $0x30] sm:$0xff] %vm387_vm0, %v386_v27 }
  0xf8 PF: > { %p15_p9 = scmp.ge.s32.totalorder %s625_s18, 6   ;;  %s824_s14 = smov %s569_s15 }
  0xf9   : > { %s825_s15 = smov %s573_s16  ;;  %s826_s16 = smov %s635_s21 }
  0xfa   : > { %s827_s17 = smov %s625_s18  ;;  %17 = sbr.rel (!%p15_p9) target bundleno = 6 (0x6), region = 72 }
 0x101   :  { %417 = vsyncpa [#allocation4], 1 }
 0x102   :  { %419 = vsyncpa [#allocation4 + $0x1], 1 }

</bundles_post_ra>
